<compile_context>
chip_gen: v5e
topology: v5e:2x2
jax: 0.10.0
libtpu: 0.0.40
codegen_flags: <defaults>
</compile_context>

<pallas_src>
import functools

import jax
import jax.numpy as jnp
from jax.experimental import pallas as pl
from jax.experimental.pallas import tpu as pltpu

LANE = 128
SUB = 8


def _ceil_to(x, m):
    return (x + m - 1) // m * m


def _m_tiling(m, cap=512):
    """Row-tile size (multiple of 8, capped so tiles double-buffer even on v7x 64MiB VMEM)."""
    if m <= cap:
        mp = _ceil_to(m, SUB)
        return mp, mp
    return _ceil_to(m, cap), cap


def _k_tiling(k):
    """Contraction tiling: only tile really large K (conv im2col) -> 512-wide steps."""
    if k <= 2048:
        return k, k
    return _ceil_to(k, 512), 512


def _apply_act(y, act):
    if act == "relu":
        return jnp.maximum(y, 0.0)
    if act == "gelu":
        # TODO(synk): torch nn.GELU() default is exact erf; tanh approx used for
        # guaranteed Mosaic lowering (tiny numeric drift).
        return jax.nn.gelu(y, approximate=True)
    if act == "tanh":
        return jnp.tanh(y)
    return y


# ----------------------------------------------------------------------------------
# Pallas kernels
# ----------------------------------------------------------------------------------
def _mm_kernel(x_ref, w_ref, b_ref, o_ref, acc_ref, *, act):
    k = pl.program_id(2)

    @pl.when(k == 0)
    def _():
        acc_ref[...] = jnp.zeros_like(acc_ref)

    acc_ref[...] += jnp.dot(x_ref[0], w_ref[...], preferred_element_type=jnp.float32)

    @pl.when(k == pl.num_programs(2) - 1)
    def _():
        y = _apply_act(acc_ref[...] + b_ref[...], act)
        o_ref[0] = y.astype(o_ref.dtype)


def _mm_res_kernel(x_ref, w_ref, b_ref, r_ref, o_ref, acc_ref, *, act):
    k = pl.program_id(2)

    @pl.when(k == 0)
    def _():
        acc_ref[...] = jnp.zeros_like(acc_ref)

    acc_ref[...] += jnp.dot(x_ref[0], w_ref[...], preferred_element_type=jnp.float32)

    @pl.when(k == pl.num_programs(2) - 1)
    def _():
        y = _apply_act(acc_ref[...] + b_ref[...], act) + r_ref[0]
        o_ref[0] = y.astype(o_ref.dtype)


def _ln_mm_kernel(x_ref, g_ref, bt_ref, w_ref, b_ref, o_ref, *, act, eps):
    """LayerNorm over the channel (K) axis fused with the following projection."""
    x = x_ref[0]                                          # (TM, C) f32
    mean = jnp.mean(x, axis=-1, keepdims=True)
    var = jnp.mean(jnp.square(x - mean), axis=-1, keepdims=True)
    xn = (x - mean) * jax.lax.rsqrt(var + eps) * g_ref[...] + bt_ref[...]
    y = jnp.dot(xn.astype(jnp.bfloat16), w_ref[...],
                preferred_element_type=jnp.float32) + b_ref[...]
    o_ref[0] = _apply_act(y, act).astype(o_ref.dtype)


def _in_kernel(x_ref, o_ref, *, eps, act):
    """InstanceNorm2d over spatial positions for a channel tile, fused ReLU."""
    x = x_ref[0]                                          # (HW, TC)
    mean = jnp.mean(x, axis=0, keepdims=True)
    var = jnp.mean(jnp.square(x - mean), axis=0, keepdims=True)
    y = (x - mean) * jax.lax.rsqrt(var + eps)
    o_ref[0] = _apply_act(y, act)


def _mha_kernel(q_ref, kv_ref, wo_ref, bo_ref, r_ref, o_ref, *, heads, dim_head, scale):
    """All heads of one batch in a single grid step; out-proj + residual fused."""
    C = heads * dim_head
    q = q_ref[0]                                          # (TMq, C) bf16
    kv = kv_ref[0]                                        # (Nk, 2C) bf16
    outs = []
    for h in range(heads):
        lo, hi = h * dim_head, (h + 1) * dim_head
        qh, kh, vh = q[:, lo:hi], kv[:, lo:hi], kv[:, C + lo:C + hi]
        s = jax.lax.dot_general(qh, kh, (((1,), (1,)), ((), ())),
                                preferred_element_type=jnp.float32) * scale
        s = s - jnp.max(s, axis=-1, keepdims=True)
        e = jnp.exp(s)
        p = e / jnp.sum(e, axis=-1, keepdims=True)        # softmax over keys
        outs.append(jnp.dot(p.astype(jnp.bfloat16), vh,
                            preferred_element_type=jnp.float32))
    o = jnp.concatenate(outs, axis=-1)                    # (TMq, C)
    y = jnp.dot(o.astype(jnp.bfloat16), wo_ref[...],
                preferred_element_type=jnp.float32) + bo_ref[...]
    o_ref[0] = y + r_ref[0]


def _text_ca_kernel(x_ref, wq_ref, bq_ref, k_ref, v_ref, wo_ref, bo_ref, r_ref, o_ref,
                    *, scale):
    """CrossAttentionBlock: q-proj + rank-1 spatial-softmax attention + out-proj + residual."""
    x = x_ref[0]                                          # (HW, C) f32
    q = jnp.dot(x.astype(jnp.bfloat16), wq_ref[...],
                preferred_element_type=jnp.float32) + bq_ref[...]
    k = k_ref[0]                                          # (1, C)
    v = v_ref[0]                                          # (1, C)
    s = jnp.sum(q * k, axis=-1, keepdims=True) * scale    # (HW, 1) VPU mul + lane reduce
    s = s - jnp.max(s, axis=0, keepdims=True)             # softmax over spatial positions
    e = jnp.exp(s)
    a = e / jnp.sum(e, axis=0, keepdims=True)
    attn_out = a * v                                      # outer product (HW, C)
    y = jnp.dot(attn_out.astype(jnp.bfloat16), wo_ref[...],
                preferred_element_type=jnp.float32) + bo_ref[...]
    o_ref[0] = y + r_ref[0]


# ----------------------------------------------------------------------------------
# Wrappers
# ----------------------------------------------------------------------------------
def linear(x, p, act="none", residual=None, out_dtype=jnp.float32):
    """x: (B, M, K) @ packed (Kp, Np) bf16 weight, tiled over M and K, f32 accumulate."""
    B, M, K = x.shape
    Kp, TK, Np, N = p["Kp"], p["TK"], p["Np"], p["N"]
    Mp, TM = _m_tiling(M)
    xb = x.astype(jnp.bfloat16)
    if (Mp, Kp) != (M, K):
        xb = jnp.pad(xb, ((0, 0), (0, Mp - M), (0, Kp - K)))
    in_specs = [
        pl.BlockSpec((1, TM, TK), lambda b, m, k: (b, m, k)),
        pl.BlockSpec((TK, Np), lambda b, m, k: (k, 0)),
        pl.BlockSpec((1, Np), lambda b, m, k: (0, 0)),
    ]
    args = [xb, p["w"], p["b"]]
    if residual is not None:
        r = residual.astype(jnp.float32)
        if (Mp, Np) != (M, r.shape[-1]):
            r = jnp.pad(r, ((0, 0), (0, Mp - M), (0, Np - r.shape[-1])))
        in_specs.append(pl.BlockSpec((1, TM, Np), lambda b, m, k: (b, m, 0)))
        args.append(r)
        kern = functools.partial(_mm_res_kernel, act=act)
    else:
        kern = functools.partial(_mm_kernel, act=act)
    out = pl.pallas_call(
        kern,
        out_shape=jax.ShapeDtypeStruct((B, Mp, Np), out_dtype),
        grid=(B, Mp // TM, Kp // TK),
        in_specs=in_specs,
        out_specs=pl.BlockSpec((1, TM, Np), lambda b, m, k: (b, m, 0)),
        scratch_shapes=[pltpu.VMEM((TM, Np), jnp.float32)],
        compiler_params=pltpu.CompilerParams(
            dimension_semantics=("parallel", "parallel", "arbitrary")),
    )(*args)
    if (Mp, Np) != (M, N):
        out = out[:, :M, :N]
    return out


def ln_linear(x, gamma, beta, p, act="none", out_dtype=jnp.float32, eps=1e-5):
    """LayerNorm(x) @ W + b with activation, fused in one kernel. x: (B, M, C)."""
    B, M, C = x.shape
    Np, N = p["Np"], p["N"]
    Mp, TM = _m_tiling(M)
    xf = x.astype(jnp.float32)
    if Mp != M:
        xf = jnp.pad(xf, ((0, 0), (0, Mp - M), (0, 0)))
    out = pl.pallas_call(
        functools.partial(_ln_mm_kernel, act=act, eps=eps),
        out_shape=jax.ShapeDtypeStruct((B, Mp, Np), out_dtype),
        grid=(B, Mp // TM),
        in_specs=[
            pl.BlockSpec((1, TM, C), lambda b, m: (b, m, 0)),
            pl.BlockSpec((1, C), lambda b, m: (0, 0)),
            pl.BlockSpec((1, C), lambda b, m: (0, 0)),
            pl.BlockSpec((C, Np), lambda b, m: (0, 0)),
            pl.BlockSpec((1, Np), lambda b, m: (0, 0)),
        ],
        out_specs=pl.BlockSpec((1, TM, Np), lambda b, m: (b, m, 0)),
        compiler_params=pltpu.CompilerParams(
            dimension_semantics=("parallel", "parallel")),
    )(xf, gamma.reshape(1, C), beta.reshape(1, C), p["w"], p["b"])
    if (Mp, Np) != (M, N):
        out = out[:, :M, :N]
    return out


def instance_norm(x, act="none", eps=1e-5):
    """x: (B, HW, C) tokens; InstanceNorm2d over spatial per channel, channel-tiled."""
    # TODO(synk): at very large HW a two-pass spatial reduction would bound VMEM further.
    B, HW, C = x.shape
    TC = LANE if C % LANE == 0 else C
    return pl.pallas_call(
        functools.partial(_in_kernel, eps=eps, act=act),
        out_shape=jax.ShapeDtypeStruct((B, HW, C), jnp.float32),
        grid=(B, C // TC),
        in_specs=[pl.BlockSpec((1, HW, TC), lambda b, c: (b, 0, c))],
        out_specs=pl.BlockSpec((1, HW, TC), lambda b, c: (b, 0, c)),
        compiler_params=pltpu.CompilerParams(
            dimension_semantics=("parallel", "parallel")),
    )(x.astype(jnp.float32))


def mha_block(q, kv, wo, bo, residual, heads, dim_head):
    """q: (B, Nq, C), kv: (B, Nk, 2C) -> attn + out-proj + residual, (B, Nq, C) f32."""
    B, Nq, C = q.shape
    Nk = kv.shape[1]
    Mp, TM = _m_tiling(Nq)
    qb = q.astype(jnp.bfloat16)
    r = residual.astype(jnp.float32)
    if Mp != Nq:
        qb = jnp.pad(qb, ((0, 0), (0, Mp - Nq), (0, 0)))
        r = jnp.pad(r, ((0, 0), (0, Mp - Nq), (0, 0)))
    out = pl.pallas_call(
        functools.partial(_mha_kernel, heads=heads, dim_head=dim_head,
                          scale=dim_head ** -0.5),
        out_shape=jax.ShapeDtypeStruct((B, Mp, C), jnp.float32),
        grid=(B, Mp // TM),
        in_specs=[
            pl.BlockSpec((1, TM, C), lambda b, m: (b, m, 0)),
            pl.BlockSpec((1, Nk, 2 * C), lambda b, m: (b, 0, 0)),
            pl.BlockSpec((C, C), lambda b, m: (0, 0)),
            pl.BlockSpec((1, C), lambda b, m: (0, 0)),
            pl.BlockSpec((1, TM, C), lambda b, m: (b, m, 0)),
        ],
        out_specs=pl.BlockSpec((1, TM, C), lambda b, m: (b, m, 0)),
        compiler_params=pltpu.CompilerParams(
            dimension_semantics=("parallel", "parallel")),
    )(qb, kv.astype(jnp.bfloat16), wo, bo, r)
    if Mp != Nq:
        out = out[:, :Nq, :]
    return out


def text_cross_attention(x_tokens, k, v, p, residual):
    """x_tokens: (B, HW, C); k, v: (1, 1, C) text features; residual: (B, HW, C)."""
    B, HW, C = x_tokens.shape
    return pl.pallas_call(
        functools.partial(_text_ca_kernel, scale=C ** -0.5),
        out_shape=jax.ShapeDtypeStruct((B, HW, C), jnp.float32),
        grid=(B,),
        in_specs=[
            pl.BlockSpec((1, HW, C), lambda b: (b, 0, 0)),
            pl.BlockSpec((C, C), lambda b: (0, 0)),
            pl.BlockSpec((1, C), lambda b: (0, 0)),
            pl.BlockSpec((1, 1, C), lambda b: (0, 0, 0)),
            pl.BlockSpec((1, 1, C), lambda b: (0, 0, 0)),
            pl.BlockSpec((C, C), lambda b: (0, 0)),
            pl.BlockSpec((1, C), lambda b: (0, 0)),
            pl.BlockSpec((1, HW, C), lambda b: (b, 0, 0)),
        ],
        out_specs=pl.BlockSpec((1, HW, C), lambda b: (b, 0, 0)),
        compiler_params=pltpu.CompilerParams(dimension_semantics=("parallel",)),
    )(x_tokens.astype(jnp.float32), p["q_w"], p["q_b"], k, v, p["o_w"], p["o_b"],
      residual.astype(jnp.float32))


# ----------------------------------------------------------------------------------
# Conv glue (NHWC layout)
# ----------------------------------------------------------------------------------
def reflect_pad_nhwc(x, p):
    return jnp.pad(x, ((0, 0), (p, p), (p, p), (0, 0)), mode="reflect")


def _extract_patches(x, kh, kw, stride):
    """x: (B, H, W, C) -> (B, Ho*Wo, kh*kw*C), patch minor order (ki, kj, c)."""
    B, H, W, C = x.shape
    Ho = (H - kh) // stride + 1
    Wo = (W - kw) // stride + 1
    slabs = []
    for ki in range(kh):
        for kj in range(kw):
            slabs.append(x[:, ki:ki + stride * Ho:stride, kj:kj + stride * Wo:stride, :])
    patches = jnp.concatenate(slabs, axis=-1)
    return patches.reshape(B, Ho * Wo, kh * kw * C), Ho, Wo


def conv2d(x, p, stride=1, pad=0, pad_mode="zero", act="none"):
    """x: (B, H, W, C) NHWC; p: packed conv weight (im2col matmul form)."""
    # TODO(synk): patch extraction still materializes a kh*kw-inflated activation in
    # HBM; an in-kernel shifted-tap accumulation conv would remove it.
    kh, kw = p["kh"], p["kw"]
    if pad > 0:
        x = reflect_pad_nhwc(x, pad) if pad_mode == "reflect" else jnp.pad(
            x, ((0, 0), (pad, pad), (pad, pad), (0, 0)))
    patches, Ho, Wo = _extract_patches(x, kh, kw, stride)
    y = linear(patches, p, act=act)
    return y.reshape(x.shape[0], Ho, Wo, p["N"])


def conv_transpose2d(x, p):
    """ConvTranspose2d(k=3, s=2, pad=1, out_pad=1) via sub-pixel phase decomposition."""
    B, H, W, Cin = x.shape
    Cout = p["Cout"]
    xp = jnp.pad(x, ((0, 0), (0, 1), (0, 1), (0, 0)))
    patches = jnp.concatenate(
        [x,
         xp[:, :H, 1:W + 1, :],
         xp[:, 1:H + 1, :W, :],
         xp[:, 1:H + 1, 1:W + 1, :]], axis=-1).reshape(B, H * W, 4 * Cin)
    y = linear(patches, p)                                 # (B, HW, 4*Cout)
    y = y.reshape(B, H, W, 2, 2, Cout)
    return y.transpose(0, 1, 3, 2, 4, 5).reshape(B, 2 * H, 2 * W, Cout)


# ----------------------------------------------------------------------------------
# Parameter packing (bf16 weights, lane-padded N, K padded for tiling)
# ----------------------------------------------------------------------------------
def pack_dense(w, b=None):
    """w: (K, N) f32 (input->output orientation)."""
    K, N = w.shape
    Kp, TK = _k_tiling(K)
    Np = _ceil_to(N, LANE)
    wp = jnp.zeros((Kp, Np), jnp.float32).at[:K, :N].set(w).astype(jnp.bfloat16)
    bp = jnp.zeros((1, Np), jnp.float32)
    if b is not None:
        bp = bp.at[0, :N].set(b)
    return dict(w=wp, b=bp, K=K, N=N, Kp=Kp, Np=Np, TK=TK)


def pack_conv(w_torch, b):
    """w_torch: (O, Cin, kh, kw) -> im2col matmul weight with (ki, kj, c) row order."""
    O, Cin, kh, kw = w_torch.shape
    d = pack_dense(w_torch.transpose(2, 3, 1, 0).reshape(kh * kw * Cin, O), b)
    d.update(kh=kh, kw=kw)
    return d


def pack_deconv_phases(w_torch, b):
    """w_torch: (Cin, Cout, 3, 3) ConvTranspose2d layout -> (4*Cin, 4*Cout) phase matmul."""
    Cin, Cout, kh, kw = w_torch.shape
    taps = {  # (tap, phase) -> (ky, kx); taps: x[i,j], x[i,j+1], x[i+1,j], x[i+1,j+1]
        (0, 0): (1, 1),
        (0, 1): (1, 2), (1, 1): (1, 0),
        (0, 2): (2, 1), (2, 2): (0, 1),
        (0, 3): (2, 2), (1, 3): (2, 0), (2, 3): (0, 2), (3, 3): (0, 0),
    }
    W4 = jnp.zeros((4 * Cin, 4 * Cout), jnp.float32)
    for (tap, phase), (ky, kx) in taps.items():
        W4 = W4.at[tap * Cin:(tap + 1) * Cin,
                   phase * Cout:(phase + 1) * Cout].set(w_torch[:, :, ky, kx])
    d = pack_dense(W4, jnp.tile(b, 4))
    d.update(Cout=Cout)
    return d


# ----------------------------------------------------------------------------------
# Module compositions
# ----------------------------------------------------------------------------------
def prior_attention_block(x1, x2, p, heads, dim_head=32):
    # x2 = CrossAttn(norm1(x2), norm2(x1)) + x2   (prior aggregate)
    q = ln_linear(x2, p["pa_ln1_g"], p["pa_ln1_b"], p["pa_q"], out_dtype=jnp.bfloat16)
    kv = ln_linear(x1, p["pa_ln2_g"], p["pa_ln2_b"], p["pa_kv"], out_dtype=jnp.bfloat16)
    x2 = mha_block(q, kv, p["pa_wo"], p["pa_bo"], x2, heads, dim_head)
    # x2 = Mlp(norm(x2)) + x2
    h = ln_linear(x2, p["pf_ln_g"], p["pf_ln_b"], p["pf_fc1"], act="gelu",
                  out_dtype=jnp.bfloat16)
    x2 = linear(h, p["pf_fc2"], residual=x2)
    # x1 = CrossAttn(norm1(x1), norm2(x2)) + x1   (feature aggregate)
    q = ln_linear(x1, p["fa_ln1_g"], p["fa_ln1_b"], p["fa_q"], out_dtype=jnp.bfloat16)
    kv = ln_linear(x2, p["fa_ln2_g"], p["fa_ln2_b"], p["fa_kv"], out_dtype=jnp.bfloat16)
    x1 = mha_block(q, kv, p["fa_wo"], p["fa_bo"], x1, heads, dim_head)
    h = ln_linear(x1, p["ff_ln_g"], p["ff_ln_b"], p["ff_fc1"], act="gelu",
                  out_dtype=jnp.bfloat16)
    x1 = linear(h, p["ff_fc2"], residual=x1)
    return x1, x2


def prior_init_fusion(x_nhwc, ihc_id, p, heads):
    B, H, W, C = x_nhwc.shape
    tokens = x_nhwc.reshape(B, H * W, C)                  # NHWC flatten == token layout
    prior = p["task_prior"][ihc_id].reshape(1, 1, C)
    priors = jnp.broadcast_to(prior, (B, 1, C))
    for blk in p["blocks"]:
        tokens, priors = prior_attention_block(tokens, priors, blk, heads)
    return tokens.reshape(B, H, W, C), priors


def residual_block_dual_prompt(x_nhwc, ihc_id, p):
    B, H, W, C = x_nhwc.shape
    res_tokens = x_nhwc.reshape(B, H * W, C)
    # conv_block: reflpad + conv3 + IN + ReLU + reflpad + conv3 + IN
    out = conv2d(x_nhwc, p["conv1"], stride=1, pad=1, pad_mode="reflect")
    out = instance_norm(out.reshape(B, H * W, C), act="relu").reshape(B, H, W, C)
    out = conv2d(out, p["conv2"], stride=1, pad=1, pad_mode="reflect")
    out = instance_norm(out.reshape(B, H * W, C))         # (B, HW, C)

    # TODO(synk): frozen CXR-BERT tokenizer+encoder has no Pallas equivalent; its CLS
    # feature is replaced by a deterministic per-id 768-d embedding; the learned
    # projection head (768->256, ReLU, 256->256) IS implemented below.
    bert_feat = p["text"]["bert_table"][ihc_id].reshape(1, 1, 768)
    t = linear(bert_feat, p["text"]["proj1"], act="relu")
    text_feat = linear(t, p["text"]["proj2"])             # (1, 1, 256)

    kv = linear(text_feat, p["ca"]["kv"])                 # fused key|value -> (1, 1, 2C)
    k, v = kv[..., :C], kv[..., C:]
    y = text_cross_attention(out, k, v, p["ca"], res_tokens)
    return y.reshape(B, H, W, C)


def generator_forward(params, x_nchw, ihc_id):
    x = jnp.transpose(x_nchw, (0, 2, 3, 1)).astype(jnp.float32)   # NCHW -> NHWC once

    def conv_in_relu(h, p, stride, pad, pad_mode):
        y = conv2d(h, p, stride=stride, pad=pad, pad_mode=pad_mode)
        Bq, Hq, Wq, Cq = y.shape
        return instance_norm(y.reshape(Bq, Hq * Wq, Cq), act="relu").reshape(Bq, Hq, Wq, Cq)

    x = conv_in_relu(x, params["init"], 1, 3, "reflect")
    x = conv_in_relu(x, params["down1"], 2, 1, "zero")
    x, _ = prior_init_fusion(x, ihc_id, params["fuse1"], heads=128 // 32)
    x = conv_in_relu(x, params["down2"], 2, 1, "zero")
    x, _ = prior_init_fusion(x, ihc_id, params["fuse2"], heads=256 // 32)
    for rp in params["res_blocks"]:
        x = residual_block_dual_prompt(x, ihc_id, rp)
    x = conv_transpose2d(x, params["up1"])
    Bq, Hq, Wq, Cq = x.shape
    x = instance_norm(x.reshape(Bq, Hq * Wq, Cq), act="relu").reshape(Bq, Hq, Wq, Cq)
    x, _ = prior_init_fusion(x, ihc_id, params["fuse3"], heads=128 // 32)
    x = conv_transpose2d(x, params["up2"])
    Bq, Hq, Wq, Cq = x.shape
    x = instance_norm(x.reshape(Bq, Hq * Wq, Cq), act="relu").reshape(Bq, Hq, Wq, Cq)
    x, _ = prior_init_fusion(x, ihc_id, params["fuse4"], heads=64 // 32)
    x = conv2d(x, params["out"], stride=1, pad=3, pad_mode="reflect", act="tanh")
    return jnp.transpose(x, (0, 3, 1, 2))                          # NHWC -> NCHW


# ----------------------------------------------------------------------------------
# Deterministic parameter construction
# ----------------------------------------------------------------------------------
class _KeyGen:
    def __init__(self, key):
        self.key = key

    def __call__(self):
        self.key, k = jax.random.split(self.key)
        return k


def _init(key, shape, scale=0.05):
    return scale * jax.random.normal(key, shape, dtype=jnp.float32)


def _make_attn(kg, C):
    return dict(
        q=pack_dense(_init(kg(), (C, C))),
        kv=pack_dense(jnp.concatenate([_init(kg(), (C, C)), _init(kg(), (C, C))], axis=1)),
        wo=_init(kg(), (C, C)).astype(jnp.bfloat16),
        bo=jnp.zeros((1, C), jnp.float32))


def _make_pab(kg, C):
    ones, zeros = jnp.ones((C,), jnp.float32), jnp.zeros((C,), jnp.float32)
    pa, fa = _make_attn(kg, C), _make_attn(kg, C)
    return dict(
        pa_ln1_g=ones, pa_ln1_b=zeros, pa_ln2_g=ones, pa_ln2_b=zeros,
        pa_q=pa["q"], pa_kv=pa["kv"], pa_wo=pa["wo"], pa_bo=pa["bo"],
        pf_ln_g=ones, pf_ln_b=zeros,
        pf_fc1=pack_dense(_init(kg(), (C, 4 * C)), jnp.zeros((4 * C,), jnp.float32)),
        pf_fc2=pack_dense(_init(kg(), (4 * C, C)), jnp.zeros((C,), jnp.float32)),
        fa_ln1_g=ones, fa_ln1_b=zeros, fa_ln2_g=ones, fa_ln2_b=zeros,
        fa_q=fa["q"], fa_kv=fa["kv"], fa_wo=fa["wo"], fa_bo=fa["bo"],
        ff_ln_g=ones, ff_ln_b=zeros,
        ff_fc1=pack_dense(_init(kg(), (C, 4 * C)), jnp.zeros((4 * C,), jnp.float32)),
        ff_fc2=pack_dense(_init(kg(), (4 * C, C)), jnp.zeros((C,), jnp.float32)))


def _make_fuse(kg, C, block_num=2, task_prior_num=6):
    return dict(task_prior=_init(kg(), (task_prior_num, C)),
                blocks=[_make_pab(kg, C) for _ in range(block_num)])


def _make_res_block(kg, C=256, text_dim=256):
    return dict(
        conv1=pack_conv(_init(kg(), (C, C, 3, 3)), jnp.zeros((C,), jnp.float32)),
        conv2=pack_conv(_init(kg(), (C, C, 3, 3)), jnp.zeros((C,), jnp.float32)),
        text=dict(
            bert_table=_init(kg(), (6, 768)),
            proj1=pack_dense(_init(kg(), (768, text_dim)), jnp.zeros((text_dim,), jnp.float32)),
            proj2=pack_dense(_init(kg(), (text_dim, text_dim)), jnp.zeros((text_dim,), jnp.float32))),
        ca=dict(
            q_w=_init(kg(), (C, C)).astype(jnp.bfloat16),
            q_b=jnp.zeros((1, C), jnp.float32),
            kv=pack_dense(jnp.concatenate([_init(kg(), (text_dim, C)),
                                           _init(kg(), (text_dim, C))], axis=1),
                          jnp.zeros((2 * C,), jnp.float32)),
            o_w=_init(kg(), (C, C)).astype(jnp.bfloat16),
            o_b=jnp.zeros((1, C), jnp.float32)))


def build_params(key, input_nc, output_nc, n_residual_blocks):
    kg = _KeyGen(key)
    # NOTE: task_prompt / task_enhancer of the PyTorch module are unused in forward()
    # and therefore omitted.
    return dict(
        init=pack_conv(_init(kg(), (64, input_nc, 7, 7)), jnp.zeros((64,), jnp.float32)),
        down1=pack_conv(_init(kg(), (128, 64, 3, 3)), jnp.zeros((128,), jnp.float32)),
        fuse1=_make_fuse(kg, 128),
        down2=pack_conv(_init(kg(), (256, 128, 3, 3)), jnp.zeros((256,), jnp.float32)),
        fuse2=_make_fuse(kg, 256),
        res_blocks=[_make_res_block(kg) for _ in range(n_residual_blocks)],
        up1=pack_deconv_phases(_init(kg(), (256, 128, 3, 3)), jnp.zeros((128,), jnp.float32)),
        fuse3=_make_fuse(kg, 128),
        up2=pack_deconv_phases(_init(kg(), (128, 64, 3, 3)), jnp.zeros((64,), jnp.float32)),
        fuse4=_make_fuse(kg, 64),
        out=pack_conv(_init(kg(), (output_nc, 64, 7, 7)), jnp.zeros((output_nc,), jnp.float32)))


# ----------------------------------------------------------------------------------
if __name__ == "__main__":
    key = jax.random.PRNGKey(0)
    k_params, k_x = jax.random.split(key)

    input_nc, output_nc = 3, 3
    n_residual_blocks = 2          # constructor arg; small for the test
    params = build_params(k_params, input_nc, output_nc, n_residual_blocks)

    x = jax.random.normal(k_x, (1, input_nc, 16, 16), dtype=jnp.float32)
    ihc_id = 2                     # IHC task id in [0, 5]

    out = generator_forward(params, x, ihc_id)
    out = jax.block_until_ready(out)
    assert out.shape == (1, output_nc, 16, 16), out.shape
    assert bool(jnp.all(jnp.isfinite(out)))
    print("KERNEL_OK")
</pallas_src>

<mosaic_0001>
module attributes {stable_mosaic.version = 11 : i64} {
  func.func @_mm_kernel(%arg0: i32, %arg1: i32, %arg2: i32, %arg3: memref<1x256x147xbf16, #tpu.memory_space<vmem>>, %arg4: memref<147x128xbf16, #tpu.memory_space<vmem>>, %arg5: memref<1x128xf32, #tpu.memory_space<vmem>>, %arg6: memref<1x256x128xf32, #tpu.memory_space<vmem>>, %arg7: memref<256x128xf32, #tpu.memory_space<vmem>>) attributes {dimension_semantics = [#tpu.dimension_semantics<parallel>, #tpu.dimension_semantics<parallel>, #tpu.dimension_semantics<arbitrary>], iteration_bounds = array<i64: 1, 1, 1>, scalar_prefetch = 0 : i64, scratch_operands = 1 : i64, tpu.core_type = #tpu.core_type<tc>, window_params = [{transform_indices = @transform_0, window_bounds = array<i64: 1, 256, 147>}, {transform_indices = @transform_1, window_bounds = array<i64: 147, 128>}, {pipeline_mode = #tpu.pipeline_mode<synchronous>, transform_indices = @transform_2, window_bounds = array<i64: 1, 128>}, {transform_indices = @transform_3, window_bounds = array<i64: 1, 256, 128>}]} {
    %c0_i32 = arith.constant 0 : i32
    %0 = arith.cmpi eq, %arg2, %c0_i32 : i32
    %1 = arith.extui %0 : i1 to i32
    %c0_i32_0 = arith.constant 0 : i32
    %2 = arith.cmpi ne, %1, %c0_i32_0 : i32
    scf.if %2 {
      %cst_11 = arith.constant 0.000000e+00 : f32
      %13 = vector.broadcast %cst_11 : f32 to vector<256x128xf32>
      %c0_12 = arith.constant 0 : index
      %c0_13 = arith.constant 0 : index
      %14 = vector.load %arg7[%c0_12, %c0_13] : memref<256x128xf32, #tpu.memory_space<vmem>>, vector<256x128xf32>
      tpu.vector_store %arg7[%c0_12, %c0_13], %13 {strides = array<i32>} : memref<256x128xf32, #tpu.memory_space<vmem>>, vector<256x128xf32>,
    } else {
    }
    %c0 = arith.constant 0 : index
    %c0_1 = arith.constant 0 : index
    %3 = vector.load %arg7[%c0, %c0_1] : memref<256x128xf32, #tpu.memory_space<vmem>>, vector<256x128xf32>
    %c0_2 = arith.constant 0 : index
    %c0_3 = arith.constant 0 : index
    %c0_4 = arith.constant 0 : index
    %4 = vector.load %arg3[%c0_2, %c0_3, %c0_4] : memref<1x256x147xbf16, #tpu.memory_space<vmem>>, vector<1x256x147xbf16>
    %5 = vector.shape_cast %4 : vector<1x256x147xbf16> to vector<256x147xbf16>
    %c0_5 = arith.constant 0 : index
    %c0_6 = arith.constant 0 : index
    %6 = vector.load %arg4[%c0_5, %c0_6] : memref<147x128xbf16, #tpu.memory_space<vmem>>, vector<147x128xbf16>
    %cst = arith.constant dense<0.000000e+00> : vector<256x128xf32>
    %7 = tpu.matmul %5, %6, %cst {dimension_numbers = #tpu.dot_dimension_numbers<[1], [0], [0], [1], [0, 0, 1, 1], [], []>} : vector<256x147xbf16>, vector<147x128xbf16>, vector<256x128xf32> -> vector<256x128xf32>
    %8 = arith.addf %3, %7 : vector<256x128xf32>
    %c0_7 = arith.constant 0 : index
    %c0_8 = arith.constant 0 : index
    %9 = vector.load %arg7[%c0_7, %c0_8] : memref<256x128xf32, #tpu.memory_space<vmem>>, vector<256x128xf32>
    tpu.vector_store %arg7[%c0_7, %c0_8], %8 {strides = array<i32>} : memref<256x128xf32, #tpu.memory_space<vmem>>, vector<256x128xf32>,
    %c0_i32_9 = arith.constant 0 : i32
    %10 = arith.cmpi eq, %arg2, %c0_i32_9 : i32
    %11 = arith.extui %10 : i1 to i32
    %c0_i32_10 = arith.constant 0 : i32
    %12 = arith.cmpi ne, %11, %c0_i32_10 : i32
    scf.if %12 {
      %c0_11 = arith.constant 0 : index
      %c0_12 = arith.constant 0 : index
      %13 = vector.load %arg7[%c0_11, %c0_12] : memref<256x128xf32, #tpu.memory_space<vmem>>, vector<256x128xf32>
      %c0_13 = arith.constant 0 : index
      %c0_14 = arith.constant 0 : index
      %14 = vector.load %arg5[%c0_13, %c0_14] : memref<1x128xf32, #tpu.memory_space<vmem>>, vector<1x128xf32>
      %15 = vector.broadcast %14 : vector<1x128xf32> to vector<256x128xf32>
      %16 = arith.addf %13, %15 : vector<256x128xf32>
      %c0_15 = arith.constant 0 : index
      %c0_16 = arith.constant 0 : index
      %c0_17 = arith.constant 0 : index
      %17 = vector.load %arg6[%c0_15, %c0_16, %c0_17] : memref<1x256x128xf32, #tpu.memory_space<vmem>>, vector<1x256x128xf32>
      %18 = vector.shape_cast %17 : vector<1x256x128xf32> to vector<256x128xf32>
      %19 = vector.shape_cast %16 : vector<256x128xf32> to vector<1x256x128xf32>
      tpu.vector_store %arg6[%c0_15, %c0_16, %c0_17], %19 {strides = array<i32>} : memref<1x256x128xf32, #tpu.memory_space<vmem>>, vector<1x256x128xf32>,
    } else {
    }
    return
  }
  func.func @transform_0(%arg0: i32, %arg1: i32, %arg2: i32) -> (i32, i32, i32) {
    %c0_i32 = arith.constant 0 : i32
    return %arg0, %arg1, %arg2 : i32, i32, i32
  }
  func.func @transform_1(%arg0: i32, %arg1: i32, %arg2: i32) -> (i32, i32) {
    %c0_i32 = arith.constant 0 : i32
    %c0_i32_0 = arith.constant 0 : i32
    return %arg2, %c0_i32 : i32, i32
  }
  func.func @transform_2(%arg0: i32, %arg1: i32, %arg2: i32) -> (i32, i32) {
    %c0_i32 = arith.constant 0 : i32
    %c0_i32_0 = arith.constant 0 : i32
    %c0_i32_1 = arith.constant 0 : i32
    return %c0_i32, %c0_i32_0 : i32, i32
  }
  func.func @transform_3(%arg0: i32, %arg1: i32, %arg2: i32) -> (i32, i32, i32) {
    %c0_i32 = arith.constant 0 : i32
    %c0_i32_0 = arith.constant 0 : i32
    return %arg0, %arg1, %c0_i32 : i32, i32, i32
  }
}

</mosaic_0001>

<bundles_post_ra>
// kernel: tpu_custom_call.1
= control target key start
LH: loop header
LB: loop body
LE: loop exit
PB: predicated region body
PF: predicated region fallthrough
CT: control target
= control target key end

     0   :  { %vm385_vm0 = vcmask 1040384   ;;  %vm386_vm1 = vcmask 1041408   ;;  %v1017_v4 = vmov 65535   ;;  %s1325_s0 = inlined_call_operand.vmem [shape: bf16[1,256,147], index: 0, kind: input, shape index: {}]   ;;  %s1326_s1 = inlined_call_operand.vmem [shape: bf16[147,128], index: 1, kind: input, shape index: {}]   ;;  %s1327_s2 = inlined_call_operand.vmem [shape: f32[1,128], index: 2, kind: input, shape index: {}]   ;;  %s1328_s3 = inlined_call_operand.hbm [shape: f32[1,256,128], index: 3, kind: output, shape index: {}]  }
   0x1   :  { %v974_v0 = vld [vmem:[%s1326_s1 + $0x38] sm:$0xff]  ;;  %v134_v1 = vld [vmem:[%s1326_s1 + $0x48] sm:$0x3]  ;;  %v973_v3 = vld [vmem:[%s1326_s1 + $0x30] sm:$0xff]  ;;  %v387_v5 = vsel %vm385_vm0, 4294967295, %v1017_v4 }
   0x2   :  { %v316_v2 = vunpack.c.l.b16 %v134_v1  ;;  %392 = vmatpush.bf16.msra.mxu0 %v974_v0  ;;  %976 = vmatpush.bf16.msra.mxu2 %v974_v0  ;;  %v388_v7 = vsel %vm386_vm1, %v387_v5, 0  ;;  %v972_v9 = vld [vmem:[%s1326_s1 + $0x28] sm:$0xff]  ;;  %v975_v10 = vld [vmem:[%s1326_s1 + $0x40] sm:$0xff] }
   0x3   :  { %v935_v11 = vld [vmem:[%s1325_s0 + $0x4] sm:$0xf]  ;;  %v759_v12 = vld [vmem:[%s1325_s0 + $0x8] sm:$0xf0] }
   0x4   :  { %v326_v6 = vpack.c.b16 %v316_v2, %v316_v2 }
   0x6   :  { %v390_v8 = vand.u32 %v388_v7, %v326_v6  ;;  %393 = vmatpush.bf16.msra.mxu0 %v973_v3  ;;  %977 = vmatpush.bf16.msra.mxu2 %v973_v3 }
   0x8   :  { %487 = vmatpush.bf16.msra.mxu1 %v390_v8  ;;  %984 = vmatpush.bf16.msra.mxu3 %v390_v8 }
   0x9   :  { %8 = vsyncpa [#allocation4], 0  ;;  %v953_v13 = vld [vmem:[%s1325_s0 + $0x94] sm:$0xf]  ;;  %v831_v14 = vld [vmem:[%s1325_s0 + $0x98] sm:$0xf0]  ;;  %v762_v15 = vor.u32 %v935_v11, %v759_v12 }
   0xa   :  { %394 = vmatpush.bf16.msra.mxu0 %v972_v9  ;;  %978 = vmatpush.bf16.msra.mxu2 %v972_v9  ;;  %v971_v16 = vld [vmem:[%s1326_s1 + $0x20] sm:$0xff]  ;;  %vm336_vm2 = vcmask 154624   ;;  %v834_v17 = vor.u32 %v953_v13, %v831_v14  ;;  %v970_v18 = vld [vmem:[%s1326_s1 + $0x18] sm:$0xff]  ;;  %v969_v19 = vld [vmem:[%s1326_s1 + $0x10] sm:$0xff]  ;;  %s743_s25 = sshll.u32 %s1328_s3, 4  ;;  %s1019_s26 = smov 128   ;;  %s744_s25 = int_to_ptr.hbm [resolvable:$true] %s743_s25 }
   0xb   :  { %v968_v20 = vld [vmem:[%s1326_s1 + $0x8] sm:$0xff]  ;;  %v937_v21 = vld [vmem:[%s1325_s0 + $0x14] sm:$0xf]  ;;  %v767_v22 = vld [vmem:[%s1325_s0 + $0x18] sm:$0xf0]  ;;  %s1020_s27 = smov 8  }
   0xc   :  { %488 = vmatpush.bf16.msra.mxu1 %v975_v10  ;;  %985 = vmatpush.bf16.msra.mxu3 %v975_v10  ;;  %v955_v23 = vld [vmem:[%s1325_s0 + $0xa4] sm:$0xf]  ;;  %v839_v24 = vld [vmem:[%s1325_s0 + $0xa8] sm:$0xf0]  ;;  %v770_v25 = vor.u32 %v937_v21, %v767_v22  ;;  %v757_v27 = vld [vmem:[%s1325_s0] sm:$0xf] }
   0xd   :  { %v967_v26 = vld [vmem:[%s1326_s1] sm:$0xff]  ;;  %v936_v28 = vld [vmem:[%s1325_s0 + $0x4] sm:$0xf0]  ;;  %v842_v31 = vor.u32 %v955_v23, %v839_v24  ;;  %v775_v35 = vld [vmem:[%s1325_s0 + $0x28] sm:$0xf0] }
   0xe   :  { %395 = vmatpush.bf16.msra.mxu0 %v971_v16  ;;  %979 = vmatpush.bf16.msra.mxu2 %v971_v16  ;;  %v821_v29 = vld [vmem:[%s1325_s0 + $0x80] sm:$0xf]  ;;  %v952_v30 = vld [vmem:[%s1325_s0 + $0x84] sm:$0xf0]  ;;  %v758_v32 = vor.u32 %v936_v28, %v757_v27  ;;  %v939_v34 = vld [vmem:[%s1325_s0 + $0x24] sm:$0xf] }
   0xf   :  { %919 = vmatmul.msk.bf16.vlgmr.msra.gmra.mxu1 %vm336_vm2, %v762_v15  ;;  %928 = vmatmul.msk.bf16.vlgmr.msra.gmra.mxu3 %vm336_vm2, %v834_v17  ;;  %v822_v33 = vor.u32 %v952_v30, %v821_v29  ;;  %v957_v36 = vld [vmem:[%s1325_s0 + $0xb4] sm:$0xf]  ;;  %v847_v37 = vld [vmem:[%s1325_s0 + $0xb8] sm:$0xf0]  ;;  %v778_v38 = vor.u32 %v939_v34, %v775_v35  ;;  %v765_v39 = vld [vmem:[%s1325_s0 + $0x10] sm:$0xf] }
  0x10   :  { %v938_v40 = vld [vmem:[%s1325_s0 + $0x14] sm:$0xf0]  ;;  %v829_v41 = vld [vmem:[%s1325_s0 + $0x90] sm:$0xf]  ;;  %v850_v43 = vor.u32 %v957_v36, %v847_v37  ;;  %v941_v46 = vld [vmem:[%s1325_s0 + $0x34] sm:$0xf] }
  0x11   :  { %v954_v42 = vld [vmem:[%s1325_s0 + $0x94] sm:$0xf0]  ;;  %v766_v44 = vor.u32 %v938_v40, %v765_v39  ;;  %v783_v47 = vld [vmem:[%s1325_s0 + $0x38] sm:$0xf0]  ;;  %v959_v48 = vld [vmem:[%s1325_s0 + $0xc4] sm:$0xf] }
  0x12   :  { %396 = vmatpush.bf16.msra.mxu0 %v970_v18  ;;  %980 = vmatpush.bf16.msra.mxu2 %v970_v18  ;;  %v830_v45 = vor.u32 %v954_v42, %v829_v41  ;;  %v855_v49 = vld [vmem:[%s1325_s0 + $0xc8] sm:$0xf0]  ;;  %v786_v50 = vor.u32 %v941_v46, %v783_v47  ;;  %v773_v51 = vld [vmem:[%s1325_s0 + $0x20] sm:$0xf]  ;;  %v940_v52 = vld [vmem:[%s1325_s0 + $0x24] sm:$0xf0] }
  0x13   :  { %v837_v53 = vld [vmem:[%s1325_s0 + $0xa0] sm:$0xf]  ;;  %v956_v54 = vld [vmem:[%s1325_s0 + $0xa4] sm:$0xf0]  ;;  %v858_v55 = vor.u32 %v959_v48, %v855_v49  ;;  %v774_v56 = vor.u32 %v940_v52, %v773_v51  ;;  %v943_v58 = vld [vmem:[%s1325_s0 + $0x44] sm:$0xf] }
  0x14   :  { %v838_v57 = vor.u32 %v956_v54, %v837_v53  ;;  %v791_v59 = vld [vmem:[%s1325_s0 + $0x48] sm:$0xf0]  ;;  %v961_v60 = vld [vmem:[%s1325_s0 + $0xd4] sm:$0xf]  ;;  %v863_v61 = vld [vmem:[%s1325_s0 + $0xd8] sm:$0xf0] }
  0x15   :  { %v794_v62 = vor.u32 %v943_v58, %v791_v59  ;;  %v781_v63 = vld [vmem:[%s1325_s0 + $0x30] sm:$0xf]  ;;  %v942_v0 = vld [vmem:[%s1325_s0 + $0x34] sm:$0xf0]  ;;  %v866_v3 = vor.u32 %v961_v60, %v863_v61  ;;  %v945_v6 = vld [vmem:[%s1325_s0 + $0x54] sm:$0xf] }
  0x16   :  { %397 = vmatpush.bf16.msra.mxu0 %v969_v19  ;;  %981 = vmatpush.bf16.msra.mxu2 %v969_v19  ;;  %v845_v1 = vld [vmem:[%s1325_s0 + $0xb0] sm:$0xf]  ;;  %v958_v2 = vld [vmem:[%s1325_s0 + $0xb4] sm:$0xf0]  ;;  %v782_v4 = vor.u32 %v942_v0, %v781_v63  ;;  %v799_v7 = vld [vmem:[%s1325_s0 + $0x58] sm:$0xf0] }
  0x17   :  { %v846_v5 = vor.u32 %v958_v2, %v845_v1  ;;  %v963_v8 = vld [vmem:[%s1325_s0 + $0xe4] sm:$0xf]  ;;  %v871_v9 = vld [vmem:[%s1325_s0 + $0xe8] sm:$0xf0]  ;;  %v802_v10 = vor.u32 %v945_v6, %v799_v7  ;;  %v789_v11 = vld [vmem:[%s1325_s0 + $0x40] sm:$0xf] }
  0x18   :  { %v944_v12 = vld [vmem:[%s1325_s0 + $0x44] sm:$0xf0]  ;;  %v853_v13 = vld [vmem:[%s1325_s0 + $0xc0] sm:$0xf]  ;;  %v874_v15 = vor.u32 %v963_v8, %v871_v9  ;;  %v947_v18 = vld [vmem:[%s1325_s0 + $0x64] sm:$0xf] }
  0x19   :  { %v960_v14 = vld [vmem:[%s1325_s0 + $0xc4] sm:$0xf0]  ;;  %v790_v16 = vor.u32 %v944_v12, %v789_v11  ;;  %v807_v19 = vld [vmem:[%s1325_s0 + $0x68] sm:$0xf0]  ;;  %v879_v21 = vld [vmem:[%s1325_s0 + $0xf8] sm:$0xf0] }
  0x1a   :  { %398 = vmatpush.bf16.msra.mxu0 %v968_v20  ;;  %982 = vmatpush.bf16.msra.mxu2 %v968_v20  ;;  %v854_v17 = vor.u32 %v960_v14, %v853_v13  ;;  %v965_v20 = vld [vmem:[%s1325_s0 + $0xf4] sm:$0xf]  ;;  %v810_v22 = vor.u32 %v947_v18, %v807_v19  ;;  %v797_v23 = vld [vmem:[%s1325_s0 + $0x50] sm:$0xf]  ;;  %v946_v24 = vld [vmem:[%s1325_s0 + $0x54] sm:$0xf0] }
  0x1b   :  { %v882_v27 = vor.u32 %v965_v20, %v879_v21  ;;  %v798_v28 = vor.u32 %v946_v24, %v797_v23  ;;  %v949_v30 = vld [vmem:[%s1325_s0 + $0x74] sm:$0xf]  ;;  %v948_v34 = vld [vmem:[%s1325_s0 + $0x64] sm:$0xf0]  ;;  %v869_v35 = vld [vmem:[%s1325_s0 + $0xe0] sm:$0xf] }
  0x1c   :  { %v964_v36 = vld [vmem:[%s1325_s0 + $0xe4] sm:$0xf0]  ;;  %v951_v39 = vld [vmem:[%s1325_s0 + $0x84] sm:$0xf]  ;;  %v823_v40 = vld [vmem:[%s1325_s0 + $0x88] sm:$0xf0] }
  0x1d   :  { %v826_v41 = vor.u32 %v951_v39, %v823_v40  ;;  %v813_v42 = vld [vmem:[%s1325_s0 + $0x70] sm:$0xf]  ;;  %v966_v46 = vld [vmem:[%s1325_s0 + $0xf4] sm:$0xf0]  ;;  %v1282_v52 = vld [vmem:[%s1327_s2] ss:$0 sm:$0xff] }
  0x1e   :  { %399 = vmatpush.bf16.msra.mxu0 %v967_v26  ;;  %983 = vmatpush.bf16.msra.mxu2 %v967_v26  ;;  %v962_v26 = vld [vmem:[%s1325_s0 + $0xd4] sm:$0xf0] }
  0x1f   :  { %920 = vmatmul.msk.bf16.gmra.mxu1 %vm336_vm2, %v770_v25  ;;  %929 = vmatmul.msk.bf16.gmra.mxu3 %vm336_vm2, %v842_v31  ;;  %v861_v25 = vld [vmem:[%s1325_s0 + $0xd0] sm:$0xf]  ;;  %v815_v31 = vld [vmem:[%s1325_s0 + $0x78] sm:$0xf0] }
  0x20   :  { %v862_v29 = vor.u32 %v962_v26, %v861_v25 }
  0x21   :  { %400 = vmatmul.bf16.vlgmr.msra.gmra.mxu0 %v758_v32  ;;  %440 = vmatmul.bf16.vlgmr.msra.gmra.mxu2 %v822_v33  ;;  %v818_v32 = vor.u32 %v949_v30, %v815_v31  ;;  %v805_v33 = vld [vmem:[%s1325_s0 + $0x60] sm:$0xf] }
  0x22   :  { %v806_v37 = vor.u32 %v948_v34, %v805_v33 }
  0x2f   :  { %921 = vmatmul.msk.bf16.gmra.mxu1 %vm336_vm2, %v778_v38  ;;  %930 = vmatmul.msk.bf16.gmra.mxu3 %vm336_vm2, %v850_v43  ;;  %v870_v38 = vor.u32 %v964_v36, %v869_v35  ;;  %v950_v43 = vld [vmem:[%s1325_s0 + $0x74] sm:$0xf0] }
  0x30   :  { %v814_v47 = vor.u32 %v950_v43, %v813_v42 }
  0x31   :  { %405 = vmatmul.bf16.gmra.mxu0 %v766_v44  ;;  %445 = vmatmul.bf16.gmra.mxu2 %v830_v45  ;;  %v877_v45 = vld [vmem:[%s1325_s0 + $0xf0] sm:$0xf]  ;;  %s1018_s0 = smov [#allocation3]  }
  0x32   :  { %v878_v48 = vor.u32 %v966_v46, %v877_v45  ;;  %s741_s2 = sshll.u32 %s1018_s0, 4  ;;  %s742_s2 = int_to_ptr.vmem [resolvable:$true] %s741_s2 }
  0x3f   :  { %922 = vmatmul.msk.bf16.gmra.mxu1 %vm336_vm2, %v786_v50  ;;  %931 = vmatmul.msk.bf16.gmra.mxu3 %vm336_vm2, %v858_v55 }
  0x41   :  { %410 = vmatmul.bf16.gmra.mxu0 %v774_v56  ;;  %450 = vmatmul.bf16.gmra.mxu2 %v838_v57 }
  0x4f   :  { %923 = vmatmul.msk.bf16.gmra.mxu1 %vm336_vm2, %v794_v62  ;;  %932 = vmatmul.msk.bf16.gmra.mxu3 %vm336_vm2, %v866_v3 }
  0x51   :  { %415 = vmatmul.bf16.gmra.mxu0 %v782_v4  ;;  %455 = vmatmul.bf16.gmra.mxu2 %v846_v5 }
  0x5f   :  { %924 = vmatmul.msk.bf16.gmra.mxu1 %vm336_vm2, %v802_v10  ;;  %933 = vmatmul.msk.bf16.gmra.mxu3 %vm336_vm2, %v874_v15 }
  0x61   :  { %420 = vmatmul.bf16.gmra.mxu0 %v790_v16  ;;  %460 = vmatmul.bf16.gmra.mxu2 %v854_v17 }
  0x6f   :  { %925 = vmatmul.msk.bf16.gmra.mxu1 %vm336_vm2, %v810_v22  ;;  %934 = vmatmul.msk.bf16.gmra.mxu3 %vm336_vm2, %v882_v27 }
  0x71   :  { %425 = vmatmul.bf16.gmra.mxu0 %v798_v28  ;;  %465 = vmatmul.bf16.gmra.mxu2 %v862_v29 }
  0x7f   :  { %926 = vmatmul.msk.bf16.gmra.mxu1 %vm336_vm2, %v818_v32 }
  0x81   :  { %430 = vmatmul.bf16.gmra.mxu0 %v806_v37  ;;  %470 = vmatmul.bf16.gmra.mxu2 %v870_v38 }
  0x8c   :  { %v490_v44 = vpop.f32.mrf.mxu1 }
  0x8f   :  { %927 = vmatmul.msk.bf16.gmra.mxu1 %vm336_vm2, %v826_v41 }
  0x91   :  { %435 = vmatmul.bf16.gmra.mxu0 %v814_v47  ;;  %475 = vmatmul.bf16.gmra.mxu2 %v878_v48 }
  0x92   :  { %v535_v51 = vpop.f32.mrf.mxu3 }
  0x94   :  { %v492_v49 = vpop.f32.mrf.mxu1 }
  0x9a   :  { %v537_v58 = vpop.f32.mrf.mxu3 }
  0x9c   :  { %v495_v50 = vpop.f32.mrf.mxu1 }
  0x9e   :  { %v401_v53 = vpop.f32.mrf.mxu0 }
  0x9f   :  { %v491_v54 = vadd.f32 %v490_v44, %v401_v53 }
  0xa1   :  { %v673_v55 = vadd.f32 %v1282_v52, %v491_v54 }
  0xa2   :  { %v540_v2 = vpop.f32.mrf.mxu3 }
  0xa3   :  { %705 = vst [vmem:[#allocation3] sm:$0xff] %v673_v55 }
  0xa4   :  { %v497_v56 = vpop.f32.mrf.mxu1  ;;  %v1285_v57 = vpop.f32.mrf.mxu2 }
  0xa6   :  { %v403_v59 = vpop.f32.mrf.mxu0 }
  0xa7   :  { %v493_v60 = vadd.f32 %v492_v49, %v403_v59 }
  0xa9   :  { %v674_v61 = vadd.f32 %v1282_v52, %v493_v60 }
  0xaa   :  { %v542_v11 = vpop.f32.mrf.mxu3 }
  0xab   :  { %706 = vst [vmem:[#allocation3 + $0x8] sm:$0xff] %v674_v61 }
  0xac   :  { %v500_v62 = vpop.f32.mrf.mxu1  ;;  %v1288_v63 = vpop.f32.mrf.mxu2 }
  0xae   :  { %v406_v0 = vpop.f32.mrf.mxu0 }
  0xaf   :  { %v496_v1 = vadd.f32 %v495_v50, %v406_v0 }
  0xb1   :  { %v675_v3 = vadd.f32 %v1282_v52, %v496_v1 }
  0xb2   :  { %v545_v20 = vpop.f32.mrf.mxu3 }
  0xb3   :  { %707 = vst [vmem:[#allocation3 + $0x10] sm:$0xff] %v675_v3 }
  0xb4   :  { %v502_v4 = vpop.f32.mrf.mxu1  ;;  %v446_v5 = vpop.f32.mrf.mxu2 }
  0xb5   :  { %v536_v6 = vadd.f32 %v535_v51, %v446_v5 }
  0xb6   :  { %v408_v7 = vpop.f32.mrf.mxu0 }
  0xb7   :  { %v498_v8 = vadd.f32 %v497_v56, %v408_v7  ;;  %v691_v9 = vadd.f32 %v1282_v52, %v536_v6 }
  0xb9   :  { %v676_v10 = vadd.f32 %v1282_v52, %v498_v8  ;;  %723 = vst [vmem:[#allocation3 + $0x90] sm:$0xff] %v691_v9 }
  0xba   :  { %v547_v29 = vpop.f32.mrf.mxu3 }
  0xbb   :  { %708 = vst [vmem:[#allocation3 + $0x18] sm:$0xff] %v676_v10 }
  0xbc   :  { %v505_v12 = vpop.f32.mrf.mxu1  ;;  %v448_v13 = vpop.f32.mrf.mxu2 }
  0xbd   :  { %v538_v14 = vadd.f32 %v537_v58, %v448_v13 }
  0xbe   :  { %v411_v15 = vpop.f32.mrf.mxu0 }
  0xbf   :  { %v501_v16 = vadd.f32 %v500_v62, %v411_v15  ;;  %v692_v17 = vadd.f32 %v1282_v52, %v538_v14 }
  0xc1   :  { %v677_v18 = vadd.f32 %v1282_v52, %v501_v16  ;;  %724 = vst [vmem:[#allocation3 + $0x98] sm:$0xff] %v692_v17 }
  0xc2   :  { %v550_v40 = vpop.f32.mrf.mxu3 }
  0xc3   :  { %709 = vst [vmem:[#allocation3 + $0x20] sm:$0xff] %v677_v18 }
  0xc4   :  { %v507_v19 = vpop.f32.mrf.mxu1  ;;  %v451_v21 = vpop.f32.mrf.mxu2 }
  0xc5   :  { %v541_v22 = vadd.f32 %v540_v2, %v451_v21 }
  0xc6   :  { %v413_v23 = vpop.f32.mrf.mxu0 }
  0xc7   :  { %v503_v24 = vadd.f32 %v502_v4, %v413_v23  ;;  %v693_v25 = vadd.f32 %v1282_v52, %v541_v22 }
  0xc9   :  { %v678_v26 = vadd.f32 %v1282_v52, %v503_v24  ;;  %725 = vst [vmem:[#allocation3 + $0xa0] sm:$0xff] %v693_v25 }
  0xca   :  { %v552_v50 = vpop.f32.mrf.mxu3 }
  0xcb   :  { %710 = vst [vmem:[#allocation3 + $0x28] sm:$0xff] %v678_v26 }
  0xcc   :  { %v510_v27 = vpop.f32.mrf.mxu1  ;;  %v453_v28 = vpop.f32.mrf.mxu2 }
  0xcd   :  { %v543_v30 = vadd.f32 %v542_v11, %v453_v28 }
  0xce   :  { %v416_v31 = vpop.f32.mrf.mxu0 }
  0xcf   :  { %v506_v32 = vadd.f32 %v505_v12, %v416_v31  ;;  %v694_v33 = vadd.f32 %v1282_v52, %v543_v30 }
  0xd1   :  { %v679_v34 = vadd.f32 %v1282_v52, %v506_v32  ;;  %726 = vst [vmem:[#allocation3 + $0xa8] sm:$0xff] %v694_v33 }
  0xd2   :  { %v555_v61 = vpop.f32.mrf.mxu3 }
  0xd3   :  { %711 = vst [vmem:[#allocation3 + $0x30] sm:$0xff] %v679_v34 }
  0xd4   :  { %v512_v35 = vpop.f32.mrf.mxu1  ;;  %v456_v36 = vpop.f32.mrf.mxu2 }
  0xd5   :  { %v546_v37 = vadd.f32 %v545_v20, %v456_v36 }
  0xd6   :  { %v418_v38 = vpop.f32.mrf.mxu0 }
  0xd7   :  { %v508_v39 = vadd.f32 %v507_v19, %v418_v38  ;;  %v695_v41 = vadd.f32 %v1282_v52, %v546_v37 }
  0xd9   :  { %v680_v42 = vadd.f32 %v1282_v52, %v508_v39  ;;  %727 = vst [vmem:[#allocation3 + $0xb0] sm:$0xff] %v695_v41 }
  0xda   :  { %v557_v7 = vpop.f32.mrf.mxu3 }
  0xdb   :  { %712 = vst [vmem:[#allocation3 + $0x38] sm:$0xff] %v680_v42 }
  0xdc   :  { %v515_v43 = vpop.f32.mrf.mxu1  ;;  %v458_v44 = vpop.f32.mrf.mxu2 }
  0xdd   :  { %v548_v45 = vadd.f32 %v547_v29, %v458_v44 }
  0xde   :  { %v421_v46 = vpop.f32.mrf.mxu0 }
  0xdf   :  { %v511_v47 = vadd.f32 %v510_v27, %v421_v46  ;;  %v696_v48 = vadd.f32 %v1282_v52, %v548_v45 }
  0xe1   :  { %v681_v49 = vadd.f32 %v1282_v52, %v511_v47  ;;  %728 = vst [vmem:[#allocation3 + $0xb8] sm:$0xff] %v696_v48 }
  0xe2   :  { %v560_v17 = vpop.f32.mrf.mxu3 }
  0xe3   :  { %713 = vst [vmem:[#allocation3 + $0x40] sm:$0xff] %v681_v49 }
  0xe4   :  { %v517_v51 = vpop.f32.mrf.mxu1  ;;  %v461_v53 = vpop.f32.mrf.mxu2 }
  0xe5   :  { %v551_v54 = vadd.f32 %v550_v40, %v461_v53 }
  0xe6   :  { %v423_v55 = vpop.f32.mrf.mxu0 }
  0xe7   :  { %v513_v56 = vadd.f32 %v512_v35, %v423_v55  ;;  %v697_v58 = vadd.f32 %v1282_v52, %v551_v54 }
  0xe9   :  { %v682_v59 = vadd.f32 %v1282_v52, %v513_v56  ;;  %729 = vst [vmem:[#allocation3 + $0xc0] sm:$0xff] %v697_v58 }
  0xea   :  { %v562_v27 = vpop.f32.mrf.mxu3 }
  0xeb   :  { %714 = vst [vmem:[#allocation3 + $0x48] sm:$0xff] %v682_v59 }
  0xec   :  { %v520_v60 = vpop.f32.mrf.mxu1  ;;  %v463_v62 = vpop.f32.mrf.mxu2 }
  0xed   :  { %v553_v0 = vadd.f32 %v552_v50, %v463_v62 }
  0xee   :  { %v426_v1 = vpop.f32.mrf.mxu0 }
  0xef   :  { %v516_v2 = vadd.f32 %v515_v43, %v426_v1  ;;  %v698_v3 = vadd.f32 %v1282_v52, %v553_v0 }
  0xf1   :  { %v683_v4 = vadd.f32 %v1282_v52, %v516_v2  ;;  %730 = vst [vmem:[#allocation3 + $0xc8] sm:$0xff] %v698_v3 }
  0xf2   :  { %v565_v38 = vpop.f32.mrf.mxu3 }
  0xf3   :  { %715 = vst [vmem:[#allocation3 + $0x50] sm:$0xff] %v683_v4 }
  0xf4   :  { %v522_v5 = vpop.f32.mrf.mxu1  ;;  %v466_v6 = vpop.f32.mrf.mxu2 }
  0xf5   :  { %v556_v8 = vadd.f32 %v555_v61, %v466_v6 }
  0xf6   :  { %v428_v9 = vpop.f32.mrf.mxu0 }
  0xf7   :  { %v518_v10 = vadd.f32 %v517_v51, %v428_v9  ;;  %v699_v11 = vadd.f32 %v1282_v52, %v556_v8 }
  0xf9   :  { %v684_v12 = vadd.f32 %v1282_v52, %v518_v10  ;;  %731 = vst [vmem:[#allocation3 + $0xd0] sm:$0xff] %v699_v11 }
  0xfb   :  { %716 = vst [vmem:[#allocation3 + $0x58] sm:$0xff] %v684_v12 }
  0xfc   :  { %v525_v13 = vpop.f32.mrf.mxu1  ;;  %v468_v14 = vpop.f32.mrf.mxu2 }
  0xfd   :  { %v558_v15 = vadd.f32 %v557_v7, %v468_v14 }
  0xfe   :  { %v431_v16 = vpop.f32.mrf.mxu0 }
  0xff   :  { %v521_v18 = vadd.f32 %v520_v60, %v431_v16  ;;  %v700_v19 = vadd.f32 %v1282_v52, %v558_v15 }
 0x101   :  { %v685_v20 = vadd.f32 %v1282_v52, %v521_v18  ;;  %732 = vst [vmem:[#allocation3 + $0xd8] sm:$0xff] %v700_v19 }
 0x103   :  { %717 = vst [vmem:[#allocation3 + $0x60] sm:$0xff] %v685_v20 }
 0x104   :  { %v527_v21 = vpop.f32.mrf.mxu1  ;;  %v471_v22 = vpop.f32.mrf.mxu2 }
 0x105   :  { %v561_v23 = vadd.f32 %v560_v17, %v471_v22 }
 0x106   :  { %v433_v24 = vpop.f32.mrf.mxu0 }
 0x107   :  { %v523_v25 = vadd.f32 %v522_v5, %v433_v24  ;;  %v701_v26 = vadd.f32 %v1282_v52, %v561_v23 }
 0x109   :  { %v686_v28 = vadd.f32 %v1282_v52, %v523_v25  ;;  %733 = vst [vmem:[#allocation3 + $0xe0] sm:$0xff] %v701_v26 }
 0x10b   :  { %718 = vst [vmem:[#allocation3 + $0x68] sm:$0xff] %v686_v28 }
 0x10c   :  { %v530_v29 = vpop.f32.mrf.mxu1  ;;  %v473_v31 = vpop.f32.mrf.mxu2 }
 0x10d   :  { %v531_v30 = vadd.f32 %v530_v29, %v1285_v57  ;;  %v563_v33 = vadd.f32 %v562_v27, %v473_v31 }
 0x10e   :  { %v436_v34 = vpop.f32.mrf.mxu0 }
 0x10f   :  { %v689_v32 = vadd.f32 %v1282_v52, %v531_v30  ;;  %v526_v35 = vadd.f32 %v525_v13, %v436_v34  ;;  %v702_v36 = vadd.f32 %v1282_v52, %v563_v33 }
 0x111   :  { %721 = vst [vmem:[#allocation3 + $0x80] sm:$0xff] %v689_v32  ;;  %v687_v37 = vadd.f32 %v1282_v52, %v526_v35 }
 0x112   :  { %734 = vst [vmem:[#allocation3 + $0xe8] sm:$0xff] %v702_v36 }
 0x113   :  { %719 = vst [vmem:[#allocation3 + $0x70] sm:$0xff] %v687_v37 }
 0x114   :  { %v532_v39 = vpop.f32.mrf.mxu1  ;;  %v476_v41 = vpop.f32.mrf.mxu2 }
 0x115   :  { %v533_v40 = vadd.f32 %v532_v39, %v1288_v63  ;;  %v566_v42 = vadd.f32 %v565_v38, %v476_v41  ;;  %v567_v63 = vpop.f32.mrf.mxu3 }
 0x116   :  { %v438_v43 = vpop.f32.mrf.mxu0 }
 0x117   :  { %v690_v57 = vadd.f32 %v1282_v52, %v533_v40  ;;  %v528_v44 = vadd.f32 %v527_v21, %v438_v43  ;;  %v703_v45 = vadd.f32 %v1282_v52, %v566_v42 }
 0x119   :  { %722 = vst [vmem:[#allocation3 + $0x88] sm:$0xff] %v690_v57  ;;  %v688_v46 = vadd.f32 %v1282_v52, %v528_v44 }
 0x11a   :  { %735 = vst [vmem:[#allocation3 + $0xf0] sm:$0xff] %v703_v45 }
 0x11b   :  { %720 = vst [vmem:[#allocation3 + $0x78] sm:$0xff] %v688_v46 }
 0x11c   :  { %v478_v47 = vpop.f32.mrf.mxu2 }
 0x11d   :  { %v568_v48 = vadd.f32 %v567_v63, %v478_v47 }
 0x11f   :  { %v704_v49 = vadd.f32 %v1282_v52, %v568_v48 }
 0x121   :  { %736 = vst [vmem:[#allocation3 + $0xf8] sm:$0xff] %v704_v49 }
 0x122   :  { %749 = dma.vmem_to_hbm [thread:$0]  %s742_s2, 4096, %s744_s25, [#allocation4], %s1019_s26, %s1019_s26, %s1020_s27  }
 0x123   :  { %1015 = dma.done.wait [#allocation4], 4096  }
 0x124   :  { %1016 = vsyncadd [#allocation4], 4294963200 }
 0x125   :  { %754 = vsyncpa [#allocation4], 1 }

</bundles_post_ra>
